<compile_context>
chip_gen: v5e
topology: v5e:2x2
jax: 0.10.0
libtpu: 0.0.40
codegen_flags: <defaults>
</compile_context>

<pallas_src>
import jax
import jax.numpy as jnp
from jax.experimental import pallas as pl
from jax.experimental.pallas import tpu as pltpu


def _ngram_kernel(ids_ref, emb_ref, w1_ref, w2_ref, out_ref,
                  emb_sc, h_sc, m_sc, l_sc, logit_sc):
    # ids_ref  : SMEM (B, C) int32            scalar-prefetched token ids
    # emb_ref  : VMEM (V_emb, 1, E)           resident embedding table
    # w1_ref   : VMEM (C*E, D)                resident, (in, out) layout
    # w2_ref   : VMEM (D, TN)                 streamed vocab tile, (in, out) layout
    # out_ref  : VMEM (B, V)                  resident across all vocab tiles
    # emb_sc   : VMEM (B, C*E)                gathered + flattened embeddings
    # h_sc     : VMEM (B, D)  f32             relu(linear1)
    # m_sc     : VMEM (B, 1)  f32             running row max
    # l_sc     : VMEM (B, 1)  f32             running sum(exp(. - m))
    # logit_sc : VMEM (nt, B, TN) f32         raw logits per vocab tile
    j = pl.program_id(0)
    B, C = ids_ref.shape
    E = emb_ref.shape[2]
    TN = w2_ref.shape[1]
    nt = logit_sc.shape[0]

    @pl.when(j == 0)
    def _():
        # Fused embedding lookup + flatten (== embeddings(inputs).view(B, -1)).
        # B and C are small static ints -> fully unrolled static stores.
        # (For very large vocab/batch, keep the table in HBM and DMA-gather rows
        #  instead of holding the full table resident in VMEM.)
        for b in range(B):
            for c in range(C):
                emb_sc[b:b + 1, c * E:(c + 1) * E] = emb_ref[ids_ref[b, c]]
        # linear1 (no bias) + ReLU, f32 accumulation on the MXU.
        h = jnp.dot(emb_sc[...].astype(w1_ref.dtype), w1_ref[...],
                    preferred_element_type=jnp.float32)
        h_sc[...] = jnp.maximum(h, 0.0)
        m_sc[...] = jnp.full(m_sc.shape, -jnp.inf, dtype=jnp.float32)
        l_sc[...] = jnp.zeros(l_sc.shape, dtype=jnp.float32)

    # linear2 (no bias) on the current vocab tile.
    logits = jnp.dot(h_sc[...].astype(w2_ref.dtype), w2_ref[...],
                     preferred_element_type=jnp.float32)          # (B, TN)
    logit_sc[j] = logits

    # Online logsumexp across vocab tiles (numerically stable).
    m_prev = m_sc[...]
    m_new = jnp.maximum(m_prev, jnp.max(logits, axis=1, keepdims=True))
    l_sc[...] = (l_sc[...] * jnp.exp(m_prev - m_new)
                 + jnp.sum(jnp.exp(logits - m_new), axis=1, keepdims=True))
    m_sc[...] = m_new

    @pl.when(j == nt - 1)
    def _():
        lse = m_sc[...] + jnp.log(l_sc[...])                      # (B, 1)
        # Static unroll: lane-dense, 128-aligned static stores into the resident
        # output block; Pallas writes the block back to HBM once, after this.
        for t in range(nt):
            out_ref[:, t * TN:(t + 1) * TN] = (logit_sc[t] - lse).astype(out_ref.dtype)


def prepare_params(emb_table, w1, w2):
    """One-time parameter preparation (hoisted out of the per-call path).

    emb_table : (vocab_size, embedding_dim)          nn.Embedding.weight
    w1        : (dim, context_size*embedding_dim)    nn.Linear(..., bias=False).weight
    w2        : (vocab_size, dim)                    nn.Linear(..., bias=False).weight
    Returns (emb3, w1_t, w2_t):
      emb3 : (vocab_size, 1, embedding_dim)  leading untiled axis for dynamic row reads
      w1_t : (C*E, dim)                      (in, out) layout
      w2_t : (dim, vocab_size)               (in, out) layout
    Table / weights may also be stored in bf16; the kernel accumulates in f32.
    """
    V, E = emb_table.shape
    return emb_table.reshape(V, 1, E), w1.T, w2.T


def ngram_forward(token_ids, emb3, w1_t, w2_t, *, vocab_tile=128):
    """Fused NGramLanguageModeler forward pass.

    token_ids : (C,) int32 (module-exact, returns (1, V)) or (B, C) int32 batched.
    emb3, w1_t, w2_t : outputs of prepare_params().
    Returns (B, V) float32 log-probabilities (one row per context).
    """
    ids = token_ids[None, :] if token_ids.ndim == 1 else token_ids
    ids = ids.astype(jnp.int32)
    B, C = ids.shape
    V_emb, _, E = emb3.shape
    in_dim, D = w1_t.shape
    D2, V = w2_t.shape
    assert in_dim == C * E and D2 == D

    TN = min(vocab_tile, V)
    assert V % TN == 0, "vocab_size must be a multiple of the vocab tile"
    nt = V // TN

    return pl.pallas_call(
        _ngram_kernel,
        out_shape=jax.ShapeDtypeStruct((B, V), jnp.float32),
        grid_spec=pltpu.PrefetchScalarGridSpec(
            num_scalar_prefetch=1,                      # token ids -> SMEM
            grid=(nt,),                                 # stream w2 over vocab tiles
            in_specs=[
                # Resident blocks (constant index maps -> fetched once).
                pl.BlockSpec((V_emb, 1, E), lambda j, ids_ref: (0, 0, 0)),
                pl.BlockSpec((in_dim, D), lambda j, ids_ref: (0, 0)),
                # Streamed (double-buffered) vocab tile of linear2.
                pl.BlockSpec((D, TN), lambda j, ids_ref: (0, j)),
            ],
            # Output stays resident in VMEM across all vocab tiles; written on
            # the last tile only (lane-dense), then flushed to HBM once.
            out_specs=pl.BlockSpec((B, V), lambda j, ids_ref: (0, 0)),
            scratch_shapes=[
                pltpu.VMEM((B, in_dim), emb3.dtype),    # gathered embeddings
                pltpu.VMEM((B, D), jnp.float32),        # relu(linear1)
                pltpu.VMEM((B, 1), jnp.float32),        # running max
                pltpu.VMEM((B, 1), jnp.float32),        # running sum-exp
                pltpu.VMEM((nt, B, TN), jnp.float32),   # raw logits per tile
            ],
        ),
        compiler_params=pltpu.CompilerParams(
            dimension_semantics=("arbitrary",),         # carried state across tiles
            vmem_limit_bytes=32 * 1024 * 1024,
        ),
    )(ids, emb3, w1_t, w2_t)


def _reference(ids, emb_table, w1, w2):
    # Pure-JAX reference using PyTorch-layout weights. ids: (B, C).
    B = ids.shape[0]
    embeds = jnp.take(emb_table, ids.reshape(-1), axis=0).reshape(B, -1)
    h = jnp.maximum(embeds @ w1.T, 0.0)
    logits = h @ w2.T
    return jax.nn.log_softmax(logits, axis=-1)


if __name__ == "__main__":
    # Small, lane/sublane-dense shapes consistent with the module.
    vocab_size = 256        # multiple of the 128-lane vocab tile
    embedding_dim = 32
    context_size = 4        # C*E = 128 -> lane-dense K for linear1
    dim = 128               # lane-dense hidden width
    batch = 8               # >= 8 contexts per call (fills MXU sublanes)

    key = jax.random.PRNGKey(0)
    k_emb, k_w1, k_w2, k_in = jax.random.split(key, 4)

    emb_table = jax.random.normal(k_emb, (vocab_size, embedding_dim), dtype=jnp.float32)
    bound1 = 1.0 / float(context_size * embedding_dim) ** 0.5
    w1 = jax.random.uniform(k_w1, (dim, context_size * embedding_dim),
                            minval=-bound1, maxval=bound1, dtype=jnp.float32)
    bound2 = 1.0 / float(dim) ** 0.5
    w2 = jax.random.uniform(k_w2, (vocab_size, dim),
                            minval=-bound2, maxval=bound2, dtype=jnp.float32)

    # Batch of contexts (each row is one module-style `inputs`).
    token_ids = jax.random.randint(k_in, (batch, context_size), 0, vocab_size,
                                   dtype=jnp.int32)

    # One-time weight preparation (no per-call transposes afterwards).
    emb3, w1_t, w2_t = prepare_params(emb_table, w1, w2)

    # Batched forward (B contexts per call).
    log_probs = jax.block_until_ready(ngram_forward(token_ids, emb3, w1_t, w2_t))
    ref = _reference(token_ids, emb_table, w1, w2)
    assert log_probs.shape == (batch, vocab_size)
    assert jnp.allclose(log_probs, ref, atol=1e-4, rtol=1e-4), "batched mismatch vs reference"

    # Module-exact semantics: a single (context_size,) input -> (1, vocab) log-probs.
    single = jax.block_until_ready(ngram_forward(token_ids[0], emb3, w1_t, w2_t))
    assert single.shape == (1, vocab_size)
    assert jnp.allclose(single, ref[:1], atol=1e-4, rtol=1e-4), "single-context mismatch"

    print("KERNEL_OK")
</pallas_src>

<mosaic_0001>
module attributes {stable_mosaic.version = 11 : i64} {
  func.func @_ngram_kernel(%arg0: i32, %arg1: memref<8x4xi32, #tpu.memory_space<smem>>, %arg2: memref<256x1x32xf32, #tpu.memory_space<vmem>>, %arg3: memref<128x128xf32, #tpu.memory_space<vmem>>, %arg4: memref<128x128xf32, #tpu.memory_space<vmem>>, %arg5: memref<8x256xf32, #tpu.memory_space<vmem>>, %arg6: memref<8x128xf32, #tpu.memory_space<vmem>>, %arg7: memref<8x128xf32, #tpu.memory_space<vmem>>, %arg8: memref<8x1xf32, #tpu.memory_space<vmem>>, %arg9: memref<8x1xf32, #tpu.memory_space<vmem>>, %arg10: memref<2x8x128xf32, #tpu.memory_space<vmem>>) attributes {dimension_semantics = [#tpu.dimension_semantics<arbitrary>], iteration_bounds = array<i64: 2>, scalar_prefetch = 1 : i64, scratch_operands = 5 : i64, tpu.core_type = #tpu.core_type<tc>, window_params = [{pipeline_mode = #tpu.pipeline_mode<synchronous>, transform_indices = @transform_0, window_bounds = array<i64: 256, 1, 32>}, {pipeline_mode = #tpu.pipeline_mode<synchronous>, transform_indices = @transform_1, window_bounds = array<i64: 128, 128>}, {transform_indices = @transform_2, window_bounds = array<i64: 128, 128>}, {pipeline_mode = #tpu.pipeline_mode<synchronous>, transform_indices = @transform_3, window_bounds = array<i64: 8, 256>}]} {
    %c0_i32 = arith.constant 0 : i32
    %0 = arith.cmpi eq, %arg0, %c0_i32 : i32
    %1 = arith.extui %0 : i1 to i32
    %c0_i32_0 = arith.constant 0 : i32
    %2 = arith.cmpi ne, %1, %c0_i32_0 : i32
    scf.if %2 {
      %c0_17 = arith.constant 0 : index
      %c0_18 = arith.constant 0 : index
      %29 = memref.load %arg1[%c0_17, %c0_18] : memref<8x4xi32, #tpu.memory_space<smem>>
      %30 = arith.index_cast %29 : i32 to index
      %c0_19 = arith.constant 0 : index
      %c0_20 = arith.constant 0 : index
      %31 = vector.load %arg2[%30, %c0_19, %c0_20] : memref<256x1x32xf32, #tpu.memory_space<vmem>>, vector<1x1x32xf32>
      %32 = vector.shape_cast %31 : vector<1x1x32xf32> to vector<1x32xf32>
      %c0_21 = arith.constant 0 : index
      %c0_22 = arith.constant 0 : index
      %33 = vector.load %arg6[%c0_21, %c0_22] : memref<8x128xf32, #tpu.memory_space<vmem>>, vector<1x32xf32>
      tpu.vector_store %arg6[%c0_21, %c0_22], %32 {strides = array<i32>} : memref<8x128xf32, #tpu.memory_space<vmem>>, vector<1x32xf32>,
      %c0_23 = arith.constant 0 : index
      %c1 = arith.constant 1 : index
      %34 = memref.load %arg1[%c0_23, %c1] : memref<8x4xi32, #tpu.memory_space<smem>>
      %35 = arith.index_cast %34 : i32 to index
      %c0_24 = arith.constant 0 : index
      %c0_25 = arith.constant 0 : index
      %36 = vector.load %arg2[%35, %c0_24, %c0_25] : memref<256x1x32xf32, #tpu.memory_space<vmem>>, vector<1x1x32xf32>
      %37 = vector.shape_cast %36 : vector<1x1x32xf32> to vector<1x32xf32>
      %c0_26 = arith.constant 0 : index
      %c32 = arith.constant 32 : index
      %38 = vector.load %arg6[%c0_26, %c32] : memref<8x128xf32, #tpu.memory_space<vmem>>, vector<1x32xf32>
      tpu.vector_store %arg6[%c0_26, %c32], %37 {strides = array<i32>} : memref<8x128xf32, #tpu.memory_space<vmem>>, vector<1x32xf32>,
      %c0_27 = arith.constant 0 : index
      %c2 = arith.constant 2 : index
      %39 = memref.load %arg1[%c0_27, %c2] : memref<8x4xi32, #tpu.memory_space<smem>>
      %40 = arith.index_cast %39 : i32 to index
      %c0_28 = arith.constant 0 : index
      %c0_29 = arith.constant 0 : index
      %41 = vector.load %arg2[%40, %c0_28, %c0_29] : memref<256x1x32xf32, #tpu.memory_space<vmem>>, vector<1x1x32xf32>
      %42 = vector.shape_cast %41 : vector<1x1x32xf32> to vector<1x32xf32>
      %c0_30 = arith.constant 0 : index
      %c64 = arith.constant 64 : index
      %43 = vector.load %arg6[%c0_30, %c64] : memref<8x128xf32, #tpu.memory_space<vmem>>, vector<1x32xf32>
      tpu.vector_store %arg6[%c0_30, %c64], %42 {strides = array<i32>} : memref<8x128xf32, #tpu.memory_space<vmem>>, vector<1x32xf32>,
      %c0_31 = arith.constant 0 : index
      %c3 = arith.constant 3 : index
      %44 = memref.load %arg1[%c0_31, %c3] : memref<8x4xi32, #tpu.memory_space<smem>>
      %45 = arith.index_cast %44 : i32 to index
      %c0_32 = arith.constant 0 : index
      %c0_33 = arith.constant 0 : index
      %46 = vector.load %arg2[%45, %c0_32, %c0_33] : memref<256x1x32xf32, #tpu.memory_space<vmem>>, vector<1x1x32xf32>
      %47 = vector.shape_cast %46 : vector<1x1x32xf32> to vector<1x32xf32>
      %c0_34 = arith.constant 0 : index
      %c96 = arith.constant 96 : index
      %48 = vector.load %arg6[%c0_34, %c96] : memref<8x128xf32, #tpu.memory_space<vmem>>, vector<1x32xf32>
      tpu.vector_store %arg6[%c0_34, %c96], %47 {strides = array<i32>} : memref<8x128xf32, #tpu.memory_space<vmem>>, vector<1x32xf32>,
      %c1_35 = arith.constant 1 : index
      %c0_36 = arith.constant 0 : index
      %49 = memref.load %arg1[%c1_35, %c0_36] : memref<8x4xi32, #tpu.memory_space<smem>>
      %50 = arith.index_cast %49 : i32 to index
      %c0_37 = arith.constant 0 : index
      %c0_38 = arith.constant 0 : index
      %51 = vector.load %arg2[%50, %c0_37, %c0_38] : memref<256x1x32xf32, #tpu.memory_space<vmem>>, vector<1x1x32xf32>
      %52 = vector.shape_cast %51 : vector<1x1x32xf32> to vector<1x32xf32>
      %c1_39 = arith.constant 1 : index
      %c0_40 = arith.constant 0 : index
      %53 = vector.load %arg6[%c1_39, %c0_40] : memref<8x128xf32, #tpu.memory_space<vmem>>, vector<1x32xf32>
      tpu.vector_store %arg6[%c1_39, %c0_40], %52 {strides = array<i32>} : memref<8x128xf32, #tpu.memory_space<vmem>>, vector<1x32xf32>,
      %c1_41 = arith.constant 1 : index
      %c1_42 = arith.constant 1 : index
      %54 = memref.load %arg1[%c1_41, %c1_42] : memref<8x4xi32, #tpu.memory_space<smem>>
      %55 = arith.index_cast %54 : i32 to index
      %c0_43 = arith.constant 0 : index
      %c0_44 = arith.constant 0 : index
      %56 = vector.load %arg2[%55, %c0_43, %c0_44] : memref<256x1x32xf32, #tpu.memory_space<vmem>>, vector<1x1x32xf32>
      %57 = vector.shape_cast %56 : vector<1x1x32xf32> to vector<1x32xf32>
      %c1_45 = arith.constant 1 : index
      %c32_46 = arith.constant 32 : index
      %58 = vector.load %arg6[%c1_45, %c32_46] : memref<8x128xf32, #tpu.memory_space<vmem>>, vector<1x32xf32>
      tpu.vector_store %arg6[%c1_45, %c32_46], %57 {strides = array<i32>} : memref<8x128xf32, #tpu.memory_space<vmem>>, vector<1x32xf32>,
      %c1_47 = arith.constant 1 : index
      %c2_48 = arith.constant 2 : index
      %59 = memref.load %arg1[%c1_47, %c2_48] : memref<8x4xi32, #tpu.memory_space<smem>>
      %60 = arith.index_cast %59 : i32 to index
      %c0_49 = arith.constant 0 : index
      %c0_50 = arith.constant 0 : index
      %61 = vector.load %arg2[%60, %c0_49, %c0_50] : memref<256x1x32xf32, #tpu.memory_space<vmem>>, vector<1x1x32xf32>
      %62 = vector.shape_cast %61 : vector<1x1x32xf32> to vector<1x32xf32>
      %c1_51 = arith.constant 1 : index
      %c64_52 = arith.constant 64 : index
      %63 = vector.load %arg6[%c1_51, %c64_52] : memref<8x128xf32, #tpu.memory_space<vmem>>, vector<1x32xf32>
      tpu.vector_store %arg6[%c1_51, %c64_52], %62 {strides = array<i32>} : memref<8x128xf32, #tpu.memory_space<vmem>>, vector<1x32xf32>,
      %c1_53 = arith.constant 1 : index
      %c3_54 = arith.constant 3 : index
      %64 = memref.load %arg1[%c1_53, %c3_54] : memref<8x4xi32, #tpu.memory_space<smem>>
      %65 = arith.index_cast %64 : i32 to index
      %c0_55 = arith.constant 0 : index
      %c0_56 = arith.constant 0 : index
      %66 = vector.load %arg2[%65, %c0_55, %c0_56] : memref<256x1x32xf32, #tpu.memory_space<vmem>>, vector<1x1x32xf32>
      %67 = vector.shape_cast %66 : vector<1x1x32xf32> to vector<1x32xf32>
      %c1_57 = arith.constant 1 : index
      %c96_58 = arith.constant 96 : index
      %68 = vector.load %arg6[%c1_57, %c96_58] : memref<8x128xf32, #tpu.memory_space<vmem>>, vector<1x32xf32>
      tpu.vector_store %arg6[%c1_57, %c96_58], %67 {strides = array<i32>} : memref<8x128xf32, #tpu.memory_space<vmem>>, vector<1x32xf32>,
      %c2_59 = arith.constant 2 : index
      %c0_60 = arith.constant 0 : index
      %69 = memref.load %arg1[%c2_59, %c0_60] : memref<8x4xi32, #tpu.memory_space<smem>>
      %70 = arith.index_cast %69 : i32 to index
      %c0_61 = arith.constant 0 : index
      %c0_62 = arith.constant 0 : index
      %71 = vector.load %arg2[%70, %c0_61, %c0_62] : memref<256x1x32xf32, #tpu.memory_space<vmem>>, vector<1x1x32xf32>
      %72 = vector.shape_cast %71 : vector<1x1x32xf32> to vector<1x32xf32>
      %c2_63 = arith.constant 2 : index
      %c0_64 = arith.constant 0 : index
      %73 = vector.load %arg6[%c2_63, %c0_64] : memref<8x128xf32, #tpu.memory_space<vmem>>, vector<1x32xf32>
      tpu.vector_store %arg6[%c2_63, %c0_64], %72 {strides = array<i32>} : memref<8x128xf32, #tpu.memory_space<vmem>>, vector<1x32xf32>,
      %c2_65 = arith.constant 2 : index
      %c1_66 = arith.constant 1 : index
      %74 = memref.load %arg1[%c2_65, %c1_66] : memref<8x4xi32, #tpu.memory_space<smem>>
      %75 = arith.index_cast %74 : i32 to index
      %c0_67 = arith.constant 0 : index
      %c0_68 = arith.constant 0 : index
      %76 = vector.load %arg2[%75, %c0_67, %c0_68] : memref<256x1x32xf32, #tpu.memory_space<vmem>>, vector<1x1x32xf32>
      %77 = vector.shape_cast %76 : vector<1x1x32xf32> to vector<1x32xf32>
      %c2_69 = arith.constant 2 : index
      %c32_70 = arith.constant 32 : index
      %78 = vector.load %arg6[%c2_69, %c32_70] : memref<8x128xf32, #tpu.memory_space<vmem>>, vector<1x32xf32>
      tpu.vector_store %arg6[%c2_69, %c32_70], %77 {strides = array<i32>} : memref<8x128xf32, #tpu.memory_space<vmem>>, vector<1x32xf32>,
      %c2_71 = arith.constant 2 : index
      %c2_72 = arith.constant 2 : index
      %79 = memref.load %arg1[%c2_71, %c2_72] : memref<8x4xi32, #tpu.memory_space<smem>>
      %80 = arith.index_cast %79 : i32 to index
      %c0_73 = arith.constant 0 : index
      %c0_74 = arith.constant 0 : index
      %81 = vector.load %arg2[%80, %c0_73, %c0_74] : memref<256x1x32xf32, #tpu.memory_space<vmem>>, vector<1x1x32xf32>
      %82 = vector.shape_cast %81 : vector<1x1x32xf32> to vector<1x32xf32>
      %c2_75 = arith.constant 2 : index
      %c64_76 = arith.constant 64 : index
      %83 = vector.load %arg6[%c2_75, %c64_76] : memref<8x128xf32, #tpu.memory_space<vmem>>, vector<1x32xf32>
      tpu.vector_store %arg6[%c2_75, %c64_76], %82 {strides = array<i32>} : memref<8x128xf32, #tpu.memory_space<vmem>>, vector<1x32xf32>,
      %c2_77 = arith.constant 2 : index
      %c3_78 = arith.constant 3 : index
      %84 = memref.load %arg1[%c2_77, %c3_78] : memref<8x4xi32, #tpu.memory_space<smem>>
      %85 = arith.index_cast %84 : i32 to index
      %c0_79 = arith.constant 0 : index
      %c0_80 = arith.constant 0 : index
      %86 = vector.load %arg2[%85, %c0_79, %c0_80] : memref<256x1x32xf32, #tpu.memory_space<vmem>>, vector<1x1x32xf32>
      %87 = vector.shape_cast %86 : vector<1x1x32xf32> to vector<1x32xf32>
      %c2_81 = arith.constant 2 : index
      %c96_82 = arith.constant 96 : index
      %88 = vector.load %arg6[%c2_81, %c96_82] : memref<8x128xf32, #tpu.memory_space<vmem>>, vector<1x32xf32>
      tpu.vector_store %arg6[%c2_81, %c96_82], %87 {strides = array<i32>} : memref<8x128xf32, #tpu.memory_space<vmem>>, vector<1x32xf32>,
      %c3_83 = arith.constant 3 : index
      %c0_84 = arith.constant 0 : index
      %89 = memref.load %arg1[%c3_83, %c0_84] : memref<8x4xi32, #tpu.memory_space<smem>>
      %90 = arith.index_cast %89 : i32 to index
      %c0_85 = arith.constant 0 : index
      %c0_86 = arith.constant 0 : index
      %91 = vector.load %arg2[%90, %c0_85, %c0_86] : memref<256x1x32xf32, #tpu.memory_space<vmem>>, vector<1x1x32xf32>
      %92 = vector.shape_cast %91 : vector<1x1x32xf32> to vector<1x32xf32>
      %c3_87 = arith.constant 3 : index
      %c0_88 = arith.constant 0 : index
      %93 = vector.load %arg6[%c3_87, %c0_88] : memref<8x128xf32, #tpu.memory_space<vmem>>, vector<1x32xf32>
      tpu.vector_store %arg6[%c3_87, %c0_88], %92 {strides = array<i32>} : memref<8x128xf32, #tpu.memory_space<vmem>>, vector<1x32xf32>,
      %c3_89 = arith.constant 3 : index
      %c1_90 = arith.constant 1 : index
      %94 = memref.load %arg1[%c3_89, %c1_90] : memref<8x4xi32, #tpu.memory_space<smem>>
      %95 = arith.index_cast %94 : i32 to index
      %c0_91 = arith.constant 0 : index
      %c0_92 = arith.constant 0 : index
      %96 = vector.load %arg2[%95, %c0_91, %c0_92] : memref<256x1x32xf32, #tpu.memory_space<vmem>>, vector<1x1x32xf32>
      %97 = vector.shape_cast %96 : vector<1x1x32xf32> to vector<1x32xf32>
      %c3_93 = arith.constant 3 : index
      %c32_94 = arith.constant 32 : index
      %98 = vector.load %arg6[%c3_93, %c32_94] : memref<8x128xf32, #tpu.memory_space<vmem>>, vector<1x32xf32>
      tpu.vector_store %arg6[%c3_93, %c32_94], %97 {strides = array<i32>} : memref<8x128xf32, #tpu.memory_space<vmem>>, vector<1x32xf32>,
      %c3_95 = arith.constant 3 : index
      %c2_96 = arith.constant 2 : index
      %99 = memref.load %arg1[%c3_95, %c2_96] : memref<8x4xi32, #tpu.memory_space<smem>>
      %100 = arith.index_cast %99 : i32 to index
      %c0_97 = arith.constant 0 : index
      %c0_98 = arith.constant 0 : index
      %101 = vector.load %arg2[%100, %c0_97, %c0_98] : memref<256x1x32xf32, #tpu.memory_space<vmem>>, vector<1x1x32xf32>
      %102 = vector.shape_cast %101 : vector<1x1x32xf32> to vector<1x32xf32>
      %c3_99 = arith.constant 3 : index
      %c64_100 = arith.constant 64 : index
      %103 = vector.load %arg6[%c3_99, %c64_100] : memref<8x128xf32, #tpu.memory_space<vmem>>, vector<1x32xf32>
      tpu.vector_store %arg6[%c3_99, %c64_100], %102 {strides = array<i32>} : memref<8x128xf32, #tpu.memory_space<vmem>>, vector<1x32xf32>,
      %c3_101 = arith.constant 3 : index
      %c3_102 = arith.constant 3 : index
      %104 = memref.load %arg1[%c3_101, %c3_102] : memref<8x4xi32, #tpu.memory_space<smem>>
      %105 = arith.index_cast %104 : i32 to index
      %c0_103 = arith.constant 0 : index
      %c0_104 = arith.constant 0 : index
      %106 = vector.load %arg2[%105, %c0_103, %c0_104] : memref<256x1x32xf32, #tpu.memory_space<vmem>>, vector<1x1x32xf32>
      %107 = vector.shape_cast %106 : vector<1x1x32xf32> to vector<1x32xf32>
      %c3_105 = arith.constant 3 : index
      %c96_106 = arith.constant 96 : index
      %108 = vector.load %arg6[%c3_105, %c96_106] : memref<8x128xf32, #tpu.memory_space<vmem>>, vector<1x32xf32>
      tpu.vector_store %arg6[%c3_105, %c96_106], %107 {strides = array<i32>} : memref<8x128xf32, #tpu.memory_space<vmem>>, vector<1x32xf32>,
      %c4 = arith.constant 4 : index
      %c0_107 = arith.constant 0 : index
      %109 = memref.load %arg1[%c4, %c0_107] : memref<8x4xi32, #tpu.memory_space<smem>>
      %110 = arith.index_cast %109 : i32 to index
      %c0_108 = arith.constant 0 : index
      %c0_109 = arith.constant 0 : index
      %111 = vector.load %arg2[%110, %c0_108, %c0_109] : memref<256x1x32xf32, #tpu.memory_space<vmem>>, vector<1x1x32xf32>
      %112 = vector.shape_cast %111 : vector<1x1x32xf32> to vector<1x32xf32>
      %c4_110 = arith.constant 4 : index
      %c0_111 = arith.constant 0 : index
      %113 = vector.load %arg6[%c4_110, %c0_111] : memref<8x128xf32, #tpu.memory_space<vmem>>, vector<1x32xf32>
      tpu.vector_store %arg6[%c4_110, %c0_111], %112 {strides = array<i32>} : memref<8x128xf32, #tpu.memory_space<vmem>>, vector<1x32xf32>,
      %c4_112 = arith.constant 4 : index
      %c1_113 = arith.constant 1 : index
      %114 = memref.load %arg1[%c4_112, %c1_113] : memref<8x4xi32, #tpu.memory_space<smem>>
      %115 = arith.index_cast %114 : i32 to index
      %c0_114 = arith.constant 0 : index
      %c0_115 = arith.constant 0 : index
      %116 = vector.load %arg2[%115, %c0_114, %c0_115] : memref<256x1x32xf32, #tpu.memory_space<vmem>>, vector<1x1x32xf32>
      %117 = vector.shape_cast %116 : vector<1x1x32xf32> to vector<1x32xf32>
      %c4_116 = arith.constant 4 : index
      %c32_117 = arith.constant 32 : index
      %118 = vector.load %arg6[%c4_116, %c32_117] : memref<8x128xf32, #tpu.memory_space<vmem>>, vector<1x32xf32>
      tpu.vector_store %arg6[%c4_116, %c32_117], %117 {strides = array<i32>} : memref<8x128xf32, #tpu.memory_space<vmem>>, vector<1x32xf32>,
      %c4_118 = arith.constant 4 : index
      %c2_119 = arith.constant 2 : index
      %119 = memref.load %arg1[%c4_118, %c2_119] : memref<8x4xi32, #tpu.memory_space<smem>>
      %120 = arith.index_cast %119 : i32 to index
      %c0_120 = arith.constant 0 : index
      %c0_121 = arith.constant 0 : index
      %121 = vector.load %arg2[%120, %c0_120, %c0_121] : memref<256x1x32xf32, #tpu.memory_space<vmem>>, vector<1x1x32xf32>
      %122 = vector.shape_cast %121 : vector<1x1x32xf32> to vector<1x32xf32>
      %c4_122 = arith.constant 4 : index
      %c64_123 = arith.constant 64 : index
      %123 = vector.load %arg6[%c4_122, %c64_123] : memref<8x128xf32, #tpu.memory_space<vmem>>, vector<1x32xf32>
      tpu.vector_store %arg6[%c4_122, %c64_123], %122 {strides = array<i32>} : memref<8x128xf32, #tpu.memory_space<vmem>>, vector<1x32xf32>,
      %c4_124 = arith.constant 4 : index
      %c3_125 = arith.constant 3 : index
      %124 = memref.load %arg1[%c4_124, %c3_125] : memref<8x4xi32, #tpu.memory_space<smem>>
      %125 = arith.index_cast %124 : i32 to index
      %c0_126 = arith.constant 0 : index
      %c0_127 = arith.constant 0 : index
      %126 = vector.load %arg2[%125, %c0_126, %c0_127] : memref<256x1x32xf32, #tpu.memory_space<vmem>>, vector<1x1x32xf32>
      %127 = vector.shape_cast %126 : vector<1x1x32xf32> to vector<1x32xf32>
      %c4_128 = arith.constant 4 : index
      %c96_129 = arith.constant 96 : index
      %128 = vector.load %arg6[%c4_128, %c96_129] : memref<8x128xf32, #tpu.memory_space<vmem>>, vector<1x32xf32>
      tpu.vector_store %arg6[%c4_128, %c96_129], %127 {strides = array<i32>} : memref<8x128xf32, #tpu.memory_space<vmem>>, vector<1x32xf32>,
      %c5 = arith.constant 5 : index
      %c0_130 = arith.constant 0 : index
      %129 = memref.load %arg1[%c5, %c0_130] : memref<8x4xi32, #tpu.memory_space<smem>>
      %130 = arith.index_cast %129 : i32 to index
      %c0_131 = arith.constant 0 : index
      %c0_132 = arith.constant 0 : index
      %131 = vector.load %arg2[%130, %c0_131, %c0_132] : memref<256x1x32xf32, #tpu.memory_space<vmem>>, vector<1x1x32xf32>
      %132 = vector.shape_cast %131 : vector<1x1x32xf32> to vector<1x32xf32>
      %c5_133 = arith.constant 5 : index
      %c0_134 = arith.constant 0 : index
      %133 = vector.load %arg6[%c5_133, %c0_134] : memref<8x128xf32, #tpu.memory_space<vmem>>, vector<1x32xf32>
      tpu.vector_store %arg6[%c5_133, %c0_134], %132 {strides = array<i32>} : memref<8x128xf32, #tpu.memory_space<vmem>>, vector<1x32xf32>,
      %c5_135 = arith.constant 5 : index
      %c1_136 = arith.constant 1 : index
      %134 = memref.load %arg1[%c5_135, %c1_136] : memref<8x4xi32, #tpu.memory_space<smem>>
      %135 = arith.index_cast %134 : i32 to index
      %c0_137 = arith.constant 0 : index
      %c0_138 = arith.constant 0 : index
      %136 = vector.load %arg2[%135, %c0_137, %c0_138] : memref<256x1x32xf32, #tpu.memory_space<vmem>>, vector<1x1x32xf32>
      %137 = vector.shape_cast %136 : vector<1x1x32xf32> to vector<1x32xf32>
      %c5_139 = arith.constant 5 : index
      %c32_140 = arith.constant 32 : index
      %138 = vector.load %arg6[%c5_139, %c32_140] : memref<8x128xf32, #tpu.memory_space<vmem>>, vector<1x32xf32>
      tpu.vector_store %arg6[%c5_139, %c32_140], %137 {strides = array<i32>} : memref<8x128xf32, #tpu.memory_space<vmem>>, vector<1x32xf32>,
      %c5_141 = arith.constant 5 : index
      %c2_142 = arith.constant 2 : index
      %139 = memref.load %arg1[%c5_141, %c2_142] : memref<8x4xi32, #tpu.memory_space<smem>>
      %140 = arith.index_cast %139 : i32 to index
      %c0_143 = arith.constant 0 : index
      %c0_144 = arith.constant 0 : index
      %141 = vector.load %arg2[%140, %c0_143, %c0_144] : memref<256x1x32xf32, #tpu.memory_space<vmem>>, vector<1x1x32xf32>
      %142 = vector.shape_cast %141 : vector<1x1x32xf32> to vector<1x32xf32>
      %c5_145 = arith.constant 5 : index
      %c64_146 = arith.constant 64 : index
      %143 = vector.load %arg6[%c5_145, %c64_146] : memref<8x128xf32, #tpu.memory_space<vmem>>, vector<1x32xf32>
      tpu.vector_store %arg6[%c5_145, %c64_146], %142 {strides = array<i32>} : memref<8x128xf32, #tpu.memory_space<vmem>>, vector<1x32xf32>,
      %c5_147 = arith.constant 5 : index
      %c3_148 = arith.constant 3 : index
      %144 = memref.load %arg1[%c5_147, %c3_148] : memref<8x4xi32, #tpu.memory_space<smem>>
      %145 = arith.index_cast %144 : i32 to index
      %c0_149 = arith.constant 0 : index
      %c0_150 = arith.constant 0 : index
      %146 = vector.load %arg2[%145, %c0_149, %c0_150] : memref<256x1x32xf32, #tpu.memory_space<vmem>>, vector<1x1x32xf32>
      %147 = vector.shape_cast %146 : vector<1x1x32xf32> to vector<1x32xf32>
      %c5_151 = arith.constant 5 : index
      %c96_152 = arith.constant 96 : index
      %148 = vector.load %arg6[%c5_151, %c96_152] : memref<8x128xf32, #tpu.memory_space<vmem>>, vector<1x32xf32>
      tpu.vector_store %arg6[%c5_151, %c96_152], %147 {strides = array<i32>} : memref<8x128xf32, #tpu.memory_space<vmem>>, vector<1x32xf32>,
      %c6 = arith.constant 6 : index
      %c0_153 = arith.constant 0 : index
      %149 = memref.load %arg1[%c6, %c0_153] : memref<8x4xi32, #tpu.memory_space<smem>>
      %150 = arith.index_cast %149 : i32 to index
      %c0_154 = arith.constant 0 : index
      %c0_155 = arith.constant 0 : index
      %151 = vector.load %arg2[%150, %c0_154, %c0_155] : memref<256x1x32xf32, #tpu.memory_space<vmem>>, vector<1x1x32xf32>
      %152 = vector.shape_cast %151 : vector<1x1x32xf32> to vector<1x32xf32>
      %c6_156 = arith.constant 6 : index
      %c0_157 = arith.constant 0 : index
      %153 = vector.load %arg6[%c6_156, %c0_157] : memref<8x128xf32, #tpu.memory_space<vmem>>, vector<1x32xf32>
      tpu.vector_store %arg6[%c6_156, %c0_157], %152 {strides = array<i32>} : memref<8x128xf32, #tpu.memory_space<vmem>>, vector<1x32xf32>,
      %c6_158 = arith.constant 6 : index
      %c1_159 = arith.constant 1 : index
      %154 = memref.load %arg1[%c6_158, %c1_159] : memref<8x4xi32, #tpu.memory_space<smem>>
      %155 = arith.index_cast %154 : i32 to index
      %c0_160 = arith.constant 0 : index
      %c0_161 = arith.constant 0 : index
      %156 = vector.load %arg2[%155, %c0_160, %c0_161] : memref<256x1x32xf32, #tpu.memory_space<vmem>>, vector<1x1x32xf32>
      %157 = vector.shape_cast %156 : vector<1x1x32xf32> to vector<1x32xf32>
      %c6_162 = arith.constant 6 : index
      %c32_163 = arith.constant 32 : index
      %158 = vector.load %arg6[%c6_162, %c32_163] : memref<8x128xf32, #tpu.memory_space<vmem>>, vector<1x32xf32>
      tpu.vector_store %arg6[%c6_162, %c32_163], %157 {strides = array<i32>} : memref<8x128xf32, #tpu.memory_space<vmem>>, vector<1x32xf32>,
      %c6_164 = arith.constant 6 : index
      %c2_165 = arith.constant 2 : index
      %159 = memref.load %arg1[%c6_164, %c2_165] : memref<8x4xi32, #tpu.memory_space<smem>>
      %160 = arith.index_cast %159 : i32 to index
      %c0_166 = arith.constant 0 : index
      %c0_167 = arith.constant 0 : index
      %161 = vector.load %arg2[%160, %c0_166, %c0_167] : memref<256x1x32xf32, #tpu.memory_space<vmem>>, vector<1x1x32xf32>
      %162 = vector.shape_cast %161 : vector<1x1x32xf32> to vector<1x32xf32>
      %c6_168 = arith.constant 6 : index
      %c64_169 = arith.constant 64 : index
      %163 = vector.load %arg6[%c6_168, %c64_169] : memref<8x128xf32, #tpu.memory_space<vmem>>, vector<1x32xf32>
      tpu.vector_store %arg6[%c6_168, %c64_169], %162 {strides = array<i32>} : memref<8x128xf32, #tpu.memory_space<vmem>>, vector<1x32xf32>,
      %c6_170 = arith.constant 6 : index
      %c3_171 = arith.constant 3 : index
      %164 = memref.load %arg1[%c6_170, %c3_171] : memref<8x4xi32, #tpu.memory_space<smem>>
      %165 = arith.index_cast %164 : i32 to index
      %c0_172 = arith.constant 0 : index
      %c0_173 = arith.constant 0 : index
      %166 = vector.load %arg2[%165, %c0_172, %c0_173] : memref<256x1x32xf32, #tpu.memory_space<vmem>>, vector<1x1x32xf32>
      %167 = vector.shape_cast %166 : vector<1x1x32xf32> to vector<1x32xf32>
      %c6_174 = arith.constant 6 : index
      %c96_175 = arith.constant 96 : index
      %168 = vector.load %arg6[%c6_174, %c96_175] : memref<8x128xf32, #tpu.memory_space<vmem>>, vector<1x32xf32>
      tpu.vector_store %arg6[%c6_174, %c96_175], %167 {strides = array<i32>} : memref<8x128xf32, #tpu.memory_space<vmem>>, vector<1x32xf32>,
      %c7 = arith.constant 7 : index
      %c0_176 = arith.constant 0 : index
      %169 = memref.load %arg1[%c7, %c0_176] : memref<8x4xi32, #tpu.memory_space<smem>>
      %170 = arith.index_cast %169 : i32 to index
      %c0_177 = arith.constant 0 : index
      %c0_178 = arith.constant 0 : index
      %171 = vector.load %arg2[%170, %c0_177, %c0_178] : memref<256x1x32xf32, #tpu.memory_space<vmem>>, vector<1x1x32xf32>
      %172 = vector.shape_cast %171 : vector<1x1x32xf32> to vector<1x32xf32>
      %c7_179 = arith.constant 7 : index
      %c0_180 = arith.constant 0 : index
      %173 = vector.load %arg6[%c7_179, %c0_180] : memref<8x128xf32, #tpu.memory_space<vmem>>, vector<1x32xf32>
      tpu.vector_store %arg6[%c7_179, %c0_180], %172 {strides = array<i32>} : memref<8x128xf32, #tpu.memory_space<vmem>>, vector<1x32xf32>,
      %c7_181 = arith.constant 7 : index
      %c1_182 = arith.constant 1 : index
      %174 = memref.load %arg1[%c7_181, %c1_182] : memref<8x4xi32, #tpu.memory_space<smem>>
      %175 = arith.index_cast %174 : i32 to index
      %c0_183 = arith.constant 0 : index
      %c0_184 = arith.constant 0 : index
      %176 = vector.load %arg2[%175, %c0_183, %c0_184] : memref<256x1x32xf32, #tpu.memory_space<vmem>>, vector<1x1x32xf32>
      %177 = vector.shape_cast %176 : vector<1x1x32xf32> to vector<1x32xf32>
      %c7_185 = arith.constant 7 : index
      %c32_186 = arith.constant 32 : index
      %178 = vector.load %arg6[%c7_185, %c32_186] : memref<8x128xf32, #tpu.memory_space<vmem>>, vector<1x32xf32>
      tpu.vector_store %arg6[%c7_185, %c32_186], %177 {strides = array<i32>} : memref<8x128xf32, #tpu.memory_space<vmem>>, vector<1x32xf32>,
      %c7_187 = arith.constant 7 : index
      %c2_188 = arith.constant 2 : index
      %179 = memref.load %arg1[%c7_187, %c2_188] : memref<8x4xi32, #tpu.memory_space<smem>>
      %180 = arith.index_cast %179 : i32 to index
      %c0_189 = arith.constant 0 : index
      %c0_190 = arith.constant 0 : index
      %181 = vector.load %arg2[%180, %c0_189, %c0_190] : memref<256x1x32xf32, #tpu.memory_space<vmem>>, vector<1x1x32xf32>
      %182 = vector.shape_cast %181 : vector<1x1x32xf32> to vector<1x32xf32>
      %c7_191 = arith.constant 7 : index
      %c64_192 = arith.constant 64 : index
      %183 = vector.load %arg6[%c7_191, %c64_192] : memref<8x128xf32, #tpu.memory_space<vmem>>, vector<1x32xf32>
      tpu.vector_store %arg6[%c7_191, %c64_192], %182 {strides = array<i32>} : memref<8x128xf32, #tpu.memory_space<vmem>>, vector<1x32xf32>,
      %c7_193 = arith.constant 7 : index
      %c3_194 = arith.constant 3 : index
      %184 = memref.load %arg1[%c7_193, %c3_194] : memref<8x4xi32, #tpu.memory_space<smem>>
      %185 = arith.index_cast %184 : i32 to index
      %c0_195 = arith.constant 0 : index
      %c0_196 = arith.constant 0 : index
      %186 = vector.load %arg2[%185, %c0_195, %c0_196] : memref<256x1x32xf32, #tpu.memory_space<vmem>>, vector<1x1x32xf32>
      %187 = vector.shape_cast %186 : vector<1x1x32xf32> to vector<1x32xf32>
      %c7_197 = arith.constant 7 : index
      %c96_198 = arith.constant 96 : index
      %188 = vector.load %arg6[%c7_197, %c96_198] : memref<8x128xf32, #tpu.memory_space<vmem>>, vector<1x32xf32>
      tpu.vector_store %arg6[%c7_197, %c96_198], %187 {strides = array<i32>} : memref<8x128xf32, #tpu.memory_space<vmem>>, vector<1x32xf32>,
      %c0_199 = arith.constant 0 : index
      %c0_200 = arith.constant 0 : index
      %189 = vector.load %arg6[%c0_199, %c0_200] : memref<8x128xf32, #tpu.memory_space<vmem>>, vector<8x128xf32>
      %c0_201 = arith.constant 0 : index
      %c0_202 = arith.constant 0 : index
      %190 = vector.load %arg3[%c0_201, %c0_202] : memref<128x128xf32, #tpu.memory_space<vmem>>, vector<128x128xf32>
      %cst_203 = arith.constant dense<0.000000e+00> : vector<8x128xf32>
      %191 = tpu.matmul %189, %190, %cst_203 {dimension_numbers = #tpu.dot_dimension_numbers<[1], [0], [0], [1], [0, 0, 1, 1], [], []>} : vector<8x128xf32>, vector<128x128xf32>, vector<8x128xf32> -> vector<8x128xf32>
      %cst_204 = arith.constant 0.000000e+00 : f32
      %192 = vector.broadcast %cst_204 : f32 to vector<8x128xf32>
      %193 = arith.maximumf %191, %192 : vector<8x128xf32>
      %c0_205 = arith.constant 0 : index
      %c0_206 = arith.constant 0 : index
      %194 = vector.load %arg7[%c0_205, %c0_206] : memref<8x128xf32, #tpu.memory_space<vmem>>, vector<8x128xf32>
      tpu.vector_store %arg7[%c0_205, %c0_206], %193 {strides = array<i32>} : memref<8x128xf32, #tpu.memory_space<vmem>>, vector<8x128xf32>,
      %cst_207 = arith.constant 0xFF800000 : f32
      %195 = vector.broadcast %cst_207 : f32 to vector<8x1xf32>
      %c0_208 = arith.constant 0 : index
      %c0_209 = arith.constant 0 : index
      %196 = vector.load %arg8[%c0_208, %c0_209] : memref<8x1xf32, #tpu.memory_space<vmem>>, vector<8x1xf32>
      tpu.vector_store %arg8[%c0_208, %c0_209], %195 {strides = array<i32>} : memref<8x1xf32, #tpu.memory_space<vmem>>, vector<8x1xf32>,
      %cst_210 = arith.constant 0.000000e+00 : f32
      %197 = vector.broadcast %cst_210 : f32 to vector<8x1xf32>
      %c0_211 = arith.constant 0 : index
      %c0_212 = arith.constant 0 : index
      %198 = vector.load %arg9[%c0_211, %c0_212] : memref<8x1xf32, #tpu.memory_space<vmem>>, vector<8x1xf32>
      tpu.vector_store %arg9[%c0_211, %c0_212], %197 {strides = array<i32>} : memref<8x1xf32, #tpu.memory_space<vmem>>, vector<8x1xf32>,
    } else {
    }
    %c0 = arith.constant 0 : index
    %c0_1 = arith.constant 0 : index
    %3 = vector.load %arg7[%c0, %c0_1] : memref<8x128xf32, #tpu.memory_space<vmem>>, vector<8x128xf32>
    %c0_2 = arith.constant 0 : index
    %c0_3 = arith.constant 0 : index
    %4 = vector.load %arg4[%c0_2, %c0_3] : memref<128x128xf32, #tpu.memory_space<vmem>>, vector<128x128xf32>
    %cst = arith.constant dense<0.000000e+00> : vector<8x128xf32>
    %5 = tpu.matmul %3, %4, %cst {dimension_numbers = #tpu.dot_dimension_numbers<[1], [0], [0], [1], [0, 0, 1, 1], [], []>} : vector<8x128xf32>, vector<128x128xf32>, vector<8x128xf32> -> vector<8x128xf32>
    %6 = arith.index_cast %arg0 : i32 to index
    %c0_4 = arith.constant 0 : index
    %c0_5 = arith.constant 0 : index
    %7 = vector.load %arg10[%6, %c0_4, %c0_5] : memref<2x8x128xf32, #tpu.memory_space<vmem>>, vector<1x8x128xf32>
    %8 = vector.shape_cast %7 : vector<1x8x128xf32> to vector<8x128xf32>
    %9 = vector.shape_cast %5 : vector<8x128xf32> to vector<1x8x128xf32>
    tpu.vector_store %arg10[%6, %c0_4, %c0_5], %9 {strides = array<i32>} : memref<2x8x128xf32, #tpu.memory_space<vmem>>, vector<1x8x128xf32>,
    %c0_6 = arith.constant 0 : index
    %c0_7 = arith.constant 0 : index
    %10 = vector.load %arg8[%c0_6, %c0_7] : memref<8x1xf32, #tpu.memory_space<vmem>>, vector<8x1xf32>
    %cst_8 = arith.constant dense<0xFF800000> : vector<8xf32>
    %11 = vector.multi_reduction <maximumf>, %5, %cst_8 [1] : vector<8x128xf32> to vector<8xf32>
    %12 = vector.shape_cast %11 : vector<8xf32> to vector<8x1xf32>
    %13 = arith.maximumf %10, %12 : vector<8x1xf32>
    %c0_9 = arith.constant 0 : index
    %c0_10 = arith.constant 0 : index
    %14 = vector.load %arg9[%c0_9, %c0_10] : memref<8x1xf32, #tpu.memory_space<vmem>>, vector<8x1xf32>
    %15 = arith.subf %10, %13 : vector<8x1xf32>
    %16 = math.exp %15 : vector<8x1xf32>
    %17 = arith.mulf %14, %16 : vector<8x1xf32>
    %18 = vector.broadcast %13 : vector<8x1xf32> to vector<8x128xf32>
    %19 = arith.subf %5, %18 : vector<8x128xf32>
    %20 = math.exp %19 : vector<8x128xf32>
    %cst_11 = arith.constant dense<0.000000e+00> : vector<8xf32>
    %21 = vector.multi_reduction <add>, %20, %cst_11 [1] : vector<8x128xf32> to vector<8xf32>
    %22 = vector.shape_cast %21 : vector<8xf32> to vector<8x1xf32>
    %23 = arith.addf %17, %22 : vector<8x1xf32>
    %c0_12 = arith.constant 0 : index
    %c0_13 = arith.constant 0 : index
    %24 = vector.load %arg9[%c0_12, %c0_13] : memref<8x1xf32, #tpu.memory_space<vmem>>, vector<8x1xf32>
    tpu.vector_store %arg9[%c0_12, %c0_13], %23 {strides = array<i32>} : memref<8x1xf32, #tpu.memory_space<vmem>>, vector<8x1xf32>,
    %c0_14 = arith.constant 0 : index
    %c0_15 = arith.constant 0 : index
    %25 = vector.load %arg8[%c0_14, %c0_15] : memref<8x1xf32, #tpu.memory_space<vmem>>, vector<8x1xf32>
    tpu.vector_store %arg8[%c0_14, %c0_15], %13 {strides = array<i32>} : memref<8x1xf32, #tpu.memory_space<vmem>>, vector<8x1xf32>,
    %c1_i32 = arith.constant 1 : i32
    %26 = arith.cmpi eq, %arg0, %c1_i32 : i32
    %27 = arith.extui %26 : i1 to i32
    %c0_i32_16 = arith.constant 0 : i32
    %28 = arith.cmpi ne, %27, %c0_i32_16 : i32
    scf.if %28 {
      %c0_17 = arith.constant 0 : index
      %c0_18 = arith.constant 0 : index
      %29 = vector.load %arg8[%c0_17, %c0_18] : memref<8x1xf32, #tpu.memory_space<vmem>>, vector<8x1xf32>
      %c0_19 = arith.constant 0 : index
      %c0_20 = arith.constant 0 : index
      %30 = vector.load %arg9[%c0_19, %c0_20] : memref<8x1xf32, #tpu.memory_space<vmem>>, vector<8x1xf32>
      %31 = math.log %30 : vector<8x1xf32>
      %32 = arith.addf %29, %31 : vector<8x1xf32>
      %c0_21 = arith.constant 0 : index
      %c0_22 = arith.constant 0 : index
      %c0_23 = arith.constant 0 : index
      %33 = vector.load %arg10[%c0_21, %c0_22, %c0_23] : memref<2x8x128xf32, #tpu.memory_space<vmem>>, vector<1x8x128xf32>
      %34 = vector.shape_cast %33 : vector<1x8x128xf32> to vector<8x128xf32>
      %35 = vector.broadcast %32 : vector<8x1xf32> to vector<8x128xf32>
      %36 = arith.subf %34, %35 : vector<8x128xf32>
      %c0_24 = arith.constant 0 : index
      %c0_25 = arith.constant 0 : index
      %37 = vector.load %arg5[%c0_24, %c0_25] : memref<8x256xf32, #tpu.memory_space<vmem>>, vector<8x128xf32>
      tpu.vector_store %arg5[%c0_24, %c0_25], %36 {strides = array<i32>} : memref<8x256xf32, #tpu.memory_space<vmem>>, vector<8x128xf32>,
      %c1 = arith.constant 1 : index
      %c0_26 = arith.constant 0 : index
      %c0_27 = arith.constant 0 : index
      %38 = vector.load %arg10[%c1, %c0_26, %c0_27] : memref<2x8x128xf32, #tpu.memory_space<vmem>>, vector<1x8x128xf32>
      %39 = vector.shape_cast %38 : vector<1x8x128xf32> to vector<8x128xf32>
      %40 = vector.broadcast %32 : vector<8x1xf32> to vector<8x128xf32>
      %41 = arith.subf %39, %40 : vector<8x128xf32>
      %c0_28 = arith.constant 0 : index
      %c128 = arith.constant 128 : index
      %42 = vector.load %arg5[%c0_28, %c128] : memref<8x256xf32, #tpu.memory_space<vmem>>, vector<8x128xf32>
      tpu.vector_store %arg5[%c0_28, %c128], %41 {strides = array<i32>} : memref<8x256xf32, #tpu.memory_space<vmem>>, vector<8x128xf32>,
    } else {
    }
    return
  }
  func.func @transform_0(%arg0: i32, %arg1: memref<8x4xi32, #tpu.memory_space<smem>>) -> (i32, i32, i32) {
    %c0_i32 = arith.constant 0 : i32
    %c0_i32_0 = arith.constant 0 : i32
    %c0_i32_1 = arith.constant 0 : i32
    %c0_i32_2 = arith.constant 0 : i32
    return %c0_i32, %c0_i32_0, %c0_i32_1 : i32, i32, i32
  }
  func.func @transform_1(%arg0: i32, %arg1: memref<8x4xi32, #tpu.memory_space<smem>>) -> (i32, i32) {
    %c0_i32 = arith.constant 0 : i32
    %c0_i32_0 = arith.constant 0 : i32
    %c0_i32_1 = arith.constant 0 : i32
    return %c0_i32, %c0_i32_0 : i32, i32
  }
  func.func @transform_2(%arg0: i32, %arg1: memref<8x4xi32, #tpu.memory_space<smem>>) -> (i32, i32) {
    %c0_i32 = arith.constant 0 : i32
    %c0_i32_0 = arith.constant 0 : i32
    return %c0_i32, %arg0 : i32, i32
  }
  func.func @transform_3(%arg0: i32, %arg1: memref<8x4xi32, #tpu.memory_space<smem>>) -> (i32, i32) {
    %c0_i32 = arith.constant 0 : i32
    %c0_i32_0 = arith.constant 0 : i32
    %c0_i32_1 = arith.constant 0 : i32
    return %c0_i32, %c0_i32_0 : i32, i32
  }
}

</mosaic_0001>

<bundles_post_ra>
// kernel: tpu_custom_call.1
= control target key start
LH: loop header
LB: loop body
LE: loop exit
PB: predicated region body
PF: predicated region fallthrough
CT: control target
= control target key end

     0   :  { %s995_s18 = smov [#allocation8]   ;;  %s1405_s0 = inlined_call_operand.vmem [shape: s32[8,4], index: 0, kind: input, shape index: {}]   ;;  %s1406_s1 = inlined_call_operand.vmem [shape: f32[256,1,32], index: 1, kind: input, shape index: {}]   ;;  %s1407_s2 = inlined_call_operand.hbm [shape: f32[128,128], index: 2, kind: input, shape index: {}]   ;;  %s1408_s3 = inlined_call_operand.vmem [shape: f32[128,256], index: 3, kind: input, shape index: {}]   ;;  %s1409_s4 = inlined_call_operand.hbm [shape: f32[8,256], index: 4, kind: output, shape index: {}]  }
   0x1   :  { %1418 = sst [smem:[#allocation22_spill]] %s1407_s2  ;;  %s10_s17 = sshll.u32 %s1405_s0, 4  ;;  %s11_s17 = int_to_ptr.vmem [resolvable:$true] %s10_s17 }
   0x2   :  { %1419 = sst [smem:[#allocation23_spill]] %s1408_s3 }
   0x3   :  { %1420 = sst [smem:[#allocation24_spill]] %s1409_s4 }
   0x4   :  { %13 = dma.vmem_to_smem %s11_s17, 128, %s995_s18, [#allocation7] }
   0x5   :  { %973 = dma.done.wait [#allocation7], 128 }
   0x6   :  { %974 = vsyncadd [#allocation7], 4294967168 }
   0x7   :  { %16 = sfence }
   0x8   :  { %17 = vsyncpa [#allocation10], 0 }
   0x9   :  { %18 = vsyncpa [#allocation11], 0  ;;  %s1035_s19 = smov 0   ;;  %s1037_s20 = smov 0  }
   0xa   :  { %s1039_s21 = smov 0  }
   0xb LB: > { %1421 = sst [smem:[#allocation17_spill]] %s989_s20  ;;  %s1051_s0 = sadd.s32 4294967295, %s993_s21   ;;  %s993_s21 = sphi %s1039_s21, %s1445_s21   ;;  %s989_s20 = sphi %s1037_s20, %s1447_s20   ;;  %s985_s19 = sphi %s1035_s19, %s1446_s19  }
   0xc   : > { %1422 = sst [smem:[#allocation18_spill]] %s1051_s0  ;;  %s1054_s22 = sadd.s32 1, %s993_s21  }
   0xd   : > { %1423 = sst [smem:[#allocation19_spill]] %s1054_s22  ;;  %s70_s23 = ssub.s32 %s993_s21, %s1054_s22 }
   0xe   : > { %s73_s24 = sadd.s32 1, %s989_s20  ;;  %p71_p0 = scmp.eq.s32.totalorder %s70_s23, 0 }
   0xf   : > { %p80_p1 = scmp.ne.s32.totalorder %s989_s20, %s985_s19  ;;  %p81_p2 = scmp.eq.s32.totalorder %s993_s21, 0 }
  0x10   : > { %p761_p3 = scmp.ge.s32.totalorder %s993_s21, 1  ;;  %p118_p5 = scmp.lt.s32.totalorder %s993_s21, 3 }
  0x11   : > { %s1064_s25 = scalar_select %p71_p0, %s989_s20, %s73_s24  }
  0x12   : > { %p1066_p4 = por %p81_p2, %p80_p1  ;;  %p762_p6 = scmp.ne.s32.totalorder %s1051_s0, 0 }
  0x13   : > { %1424 = sst [smem:[#allocation20_spill]] %s1064_s25  ;;  %p819_p7 = scmp.eq.s32.totalorder %s1051_s0, 0 }
  0x14   : > { %p1073_p8 = pnand %p761_p3, %p118_p5  ;;  %s1427_s2 = sld [smem:[#allocation22_spill]] }
  0x15   : > { %s996_s5 = smov [#allocation9]   ;;  %s997_s7 = smov 128  }
  0x16   : > { %p815_p9 = pneg %p1073_p8  ;;  %s134_s6 = sshll.u32 %s996_s5, 4  ;;  %s135_s6 = int_to_ptr.vmem [resolvable:$true] %s134_s6 }
  0x17   : > { %s998_s8 = smov 8   ;;  %p763_p11 = scmp.ge.s32.totalorder %s993_s21, 2 }
  0x18   : > { %p816_p10 = pnand %p819_p7, %p815_p9 }
  0x19   : > { %144 = sbr.rel (%p763_p11) target bundleno = 56 (0x38), region = 24 }
  0x1a   : > { %s132_s30 = sshll.u32 %s1427_s2, 4  ;;  %s133_s30 = int_to_ptr.hbm [resolvable:$true] %s132_s30 }
  0x1b   : > { %818 = dma.hbm_to_vmem [thread:$0]  (!%p816_p10), %s133_s30, 2048, %s135_s6, [#allocation10], %s997_s7, %s997_s7, %s998_s8  }
  0x1e   : > { %147 = sbr.rel (!%p1066_p4) target bundleno = 56 (0x38), region = 28  ;;  %s149_s9 = sand.u32 (%p1066_p4), 1, %s989_s20  }
  0x1f   : > { %s765_s10 = sshll.u32 (%p1066_p4), %s993_s21, 3  ;;  %s764_s11 = sshll.u32 (%p1066_p4), %s149_s9, 7 }
  0x20   : > { %s1428_s3 = sld [smem:[#allocation23_spill]] (%p1066_p4)  ;;  %s151_s15 = scalar_lea.vmem (%p1066_p4), [#allocation12], %s764_s11 }
  0x26   : > { %s1092_s14 = scalar_lea.vmem %s1428_s3, %s765_s10 }
  0x27   : > { %v212_v0 = vld [vmem:[%s1092_s14] sm:$0xff]  ;;  %v214_v1 = vld [vmem:[%s1092_s14 + $0x10] sm:$0xff] }
  0x28   : > { %v216_v2 = vld [vmem:[%s1092_s14 + $0x20] sm:$0xff]  ;;  %213 = vst [vmem:[%s151_s15] sm:$0xff] %v212_v0  ;;  %v218_v3 = vld [vmem:[%s1092_s14 + $0x30] sm:$0xff] }
  0x29   : > { %215 = vst [vmem:[%s151_s15 + $0x8] sm:$0xff] %v214_v1  ;;  %v220_v4 = vld [vmem:[%s1092_s14 + $0x40] sm:$0xff]  ;;  %v222_v5 = vld [vmem:[%s1092_s14 + $0x50] sm:$0xff] }
  0x2a   : > { %217 = vst [vmem:[%s151_s15 + $0x10] sm:$0xff] %v216_v2  ;;  %v224_v6 = vld [vmem:[%s1092_s14 + $0x60] sm:$0xff]  ;;  %v226_v7 = vld [vmem:[%s1092_s14 + $0x70] sm:$0xff] }
  0x2b   : > { %219 = vst [vmem:[%s151_s15 + $0x18] sm:$0xff] %v218_v3  ;;  %v228_v8 = vld [vmem:[%s1092_s14 + $0x80] sm:$0xff]  ;;  %v230_v9 = vld [vmem:[%s1092_s14 + $0x90] sm:$0xff] }
  0x2c   : > { %221 = vst [vmem:[%s151_s15 + $0x20] sm:$0xff] %v220_v4  ;;  %v232_v10 = vld [vmem:[%s1092_s14 + $0xa0] sm:$0xff]  ;;  %v234_v11 = vld [vmem:[%s1092_s14 + $0xb0] sm:$0xff] }
  0x2d   : > { %223 = vst [vmem:[%s151_s15 + $0x28] sm:$0xff] %v222_v5  ;;  %v236_v12 = vld [vmem:[%s1092_s14 + $0xc0] sm:$0xff]  ;;  %v238_v13 = vld [vmem:[%s1092_s14 + $0xd0] sm:$0xff] }
  0x2e   : > { %225 = vst [vmem:[%s151_s15 + $0x30] sm:$0xff] %v224_v6  ;;  %v240_v14 = vld [vmem:[%s1092_s14 + $0xe0] sm:$0xff]  ;;  %v242_v15 = vld [vmem:[%s1092_s14 + $0xf0] sm:$0xff] }
  0x2f   : > { %227 = vst [vmem:[%s151_s15 + $0x38] sm:$0xff] %v226_v7 }
  0x30   : > { %229 = vst [vmem:[%s151_s15 + $0x40] sm:$0xff] %v228_v8 }
  0x31   : > { %231 = vst [vmem:[%s151_s15 + $0x48] sm:$0xff] %v230_v9 }
  0x32   : > { %233 = vst [vmem:[%s151_s15 + $0x50] sm:$0xff] %v232_v10 }
  0x33   : > { %235 = vst [vmem:[%s151_s15 + $0x58] sm:$0xff] %v234_v11 }
  0x34   : > { %237 = vst [vmem:[%s151_s15 + $0x60] sm:$0xff] %v236_v12 }
  0x35   : > { %239 = vst [vmem:[%s151_s15 + $0x68] sm:$0xff] %v238_v13 }
  0x36   : > { %241 = vst [vmem:[%s151_s15 + $0x70] sm:$0xff] %v240_v14 }
  0x37   : > { %243 = vst [vmem:[%s151_s15 + $0x78] sm:$0xff] %v242_v15 }
  0x38 PF: > { %252 = sbr.rel (%p1073_p8) target bundleno = 1055 (0x41f), region = 66 }
  0x3d   : > { %976 = dma.done.wait (%p819_p7), [#allocation10], 2048  }
  0x3e   : > { %978 = vsyncadd (%p819_p7), [#allocation10], 4294965248  ;;  %s260_s16 = sand.u32 1, %s985_s19   ;;  %281 = sbr.rel (%p762_p6) target bundleno = 380 (0x17c), region = 78 }
  0x3f   : > { %s768_s17 = sshll.u32 %s260_s16, 7  ;;  %s778_s21 = sld [smem:[#allocation8 + $0x101]] (!%p762_p6) }
  0x40   : > { %s1117_s18 = scalar_lea.vmem [#allocation12], %s768_s17  ;;  %s770_s23 = sld [smem:[#allocation8 + $0x1]] (!%p762_p6) }
  0x41   : > { %1429 = sst [smem:[#allocation21_spill]] %s1117_s18  ;;  %s1410_s14 = smov (!%p762_p6), 32  }
  0x42   : > { %s782_s24 = sld [smem:[#allocation8 + $0x181]] (!%p762_p6) }
  0x43   : > { %s774_s26 = sld [smem:[#allocation8 + $0x81]]  ;;  %vm285_vm0 = vcmask 253952   ;;  %vm295_vm1 = vcmask 516352   ;;  %vm305_vm2 = vcmask 778752   ;;  %v550_v53 = vld [vmem:[#allocation9 + $0x78] sm:$0xff]  ;;  %v549_v54 = vld [vmem:[#allocation9 + $0x70] sm:$0xff] }
  0x44   : > { %s1121_s27 = sld [smem:[#allocation8 + $0x381]]  ;;  %551 = vmatpush.msra.mxu0 %v550_v53  ;;  %v548_v55 = vld [vmem:[#allocation9 + $0x68] sm:$0xff]  ;;  %v547_v57 = vld [vmem:[#allocation9 + $0x60] sm:$0xff]  ;;  %v546_v60 = vld [vmem:[#allocation9 + $0x58] sm:$0xff]  ;;  %vm315_vm3 = vcmask 1041152   ;;  %vm573_vm4 = vcmask 7168  }
  0x45   : > { %s1123_s28 = sld [smem:[#allocation8 + $0x301]]  ;;  %s353_s19 = scalar_lea.vmem %s1406_s1, %s778_s21  ;;  %v545_v61 = vld [vmem:[#allocation9 + $0x50] sm:$0xff]  ;;  %v544_v62 = vld [vmem:[#allocation9 + $0x48] sm:$0xff]  ;;  %v543_v0 = vld [vmem:[#allocation9 + $0x40] sm:$0xff] }
  0x46   : > { %s786_s5 = sld [smem:[#allocation8 + $0x201]]  ;;  %v859_v16 = vld [vmem:[%s353_s19] ss:$0 sm:$0xff]  ;;  %s288_s8 = scalar_lea.vmem %s1406_s1, %s770_s23  ;;  %552 = vmatpush.msra.mxu0 %v549_v54  ;;  %v542_v3 = vld [vmem:[#allocation9 + $0x38] sm:$0xff]  ;;  %v540_v5 = vld [vmem:[#allocation9 + $0x28] sm:$0xff] }
  0x47   : > { %s1131_s9 = sld [smem:[#allocation8 + $0x102]]  ;;  %v860_v17 = vld [vmem:[%s288_s8] ss:$0 sm:$0xff]  ;;  %357 = vrot.lane.b32.xlu1 %v859_v16, %s1410_s14  ;;  %v539_v7 = vld [vmem:[#allocation9 + $0x20] sm:$0xff]  ;;  %v538_v10 = vld [vmem:[#allocation9 + $0x18] sm:$0xff] }
  0x48   : > { %s384_s12 = scalar_lea.vmem %s1406_s1, %s782_s24  ;;  %s1136_s13 = sld [smem:[#allocation8 + $0x82]]  ;;  %292 = vrot.lane.b32.xlu0 %v860_v17, %s1410_s14  ;;  %553 = vmatpush.msra.mxu0 %v548_v55  ;;  %v541_v4 = vld [vmem:[#allocation9 + $0x30] sm:$0xff]  ;;  %v536_v12 = vld [vmem:[#allocation9 + $0x8] sm:$0xff]  ;;  %v535_v14 = vld [vmem:[#allocation9] sm:$0xff] }
  0x49   : > { %s322_s17 = scalar_lea.vmem %s1406_s1, %s774_s26  ;;  %s790_s21 = sld [smem:[#allocation8 + $0x281]]  ;;  %v861_v18 = vld [vmem:[%s384_s12] ss:$0 sm:$0xff] }
  0x4a   : > { %s508_s30 = scalar_lea.vmem %s1406_s1, %s1121_s27  ;;  %s1147_s19 = sld [smem:[#allocation8 + $0x282]]  ;;  %v862_v20 = vld [vmem:[%s322_s17] ss:$0 sm:$0xff]  ;;  %554 = vmatpush.msra.mxu0 %v547_v57 }
  0x4b   : > { %s1153_s8 = sld [smem:[#allocation8 + $0x202]]  ;;  %v863_v22 = vld [vmem:[%s508_s30] ss:$0 sm:$0xff]  ;;  %s1430_s3 = scalar_lea.vmem %s1406_s1, %s1123_s28 }
  0x4c   : > { %s415_s11 = scalar_lea.vmem %s1406_s1, %s786_s5  ;;  %s1158_s15 = sld [smem:[#allocation8 + $0x2]]  ;;  %v864_v23 = vld [vmem:[%s1430_s3] ss:$0 sm:$0xff]  ;;  %555 = vmatpush.msra.mxu0 %v546_v60 }
  0x4d   : > { %v865_v19 = vld [vmem:[%s415_s11] ss:$0 sm:$0xff]  ;;  %s1164_s29 = sld [smem:[#allocation8 + $0x3]]  ;;  %s1431_s30 = smov 32  }
  0x4e   : > { %s1170_s7 = sld [smem:[#allocation8 + $0x382]]  ;;  %419 = vrot.lane.b32.xlu2 %v865_v19, %s1410_s14  ;;  %s1432_s24 = scalar_lea.vmem %s1406_s1, %s1131_s9  ;;  %556 = vmatpush.msra.mxu0 %v545_v61  ;;  %v537_v11 = vld [vmem:[#allocation9 + $0x10] sm:$0xff] }
  0x4f   : > { %s446_s26 = scalar_lea.vmem %s1406_s1, %s790_s21  ;;  %s1176_s11 = sld [smem:[#allocation8 + $0x182]]  ;;  %388 = vrot.lane.b32.xlu1 %v861_v18, %s1410_s14  ;;  %v866_v25 = vld [vmem:[%s1432_s24] ss:$0 sm:$0xff] }
  0x50   : > { %s1182_s23 = sld [smem:[#allocation8 + $0x183]]  ;;  %326 = vrot.lane.b32.xlu0 %v862_v20, %s1410_s14  ;;  %v868_v21 = vld [vmem:[%s446_s26] ss:$0 sm:$0xff]  ;;  %s1433_s4 = scalar_lea.vmem %s1406_s1, %s1136_s13  ;;  %557 = vmatpush.msra.mxu0 %v544_v62 }
  0x51   : > { %s1189_s2 = sld [smem:[#allocation8 + $0x103]]  ;;  %v867_v26 = vld [vmem:[%s1433_s4] ss:$0 sm:$0xff]  ;;  %s1434_s9 = scalar_lea.vmem %s1406_s1, %s1147_s19 }
  0x52   : > { %s298_s10 = scalar_lea.vmem %s1406_s1, %s1158_s15  ;;  %s1196_s27 = sld [smem:[#allocation8 + $0x302]]  ;;  %v869_v28 = vld [vmem:[%s1434_s9] ss:$0 sm:$0xff]  ;;  %558 = vmatpush.msra.mxu0 %v543_v0 }
  0x53   : > { %s1202_s25 = sld [smem:[#allocation8 + $0x303]]  ;;  %v871_v24 = vld [vmem:[%s298_s10] ss:$0 sm:$0xff]  ;;  %s1436_s16 = scalar_lea.vmem %s1406_s1, %s1164_s29 }
  0x54   : > { %s1208_s14 = sld [smem:[#allocation8 + $0x283]]  ;;  %v872_v31 = vld [vmem:[%s1436_s16] ss:$0 sm:$0xff]  ;;  %s1437_s19 = scalar_lea.vmem %s1406_s1, %s1170_s7  ;;  %559 = vmatpush.msra.mxu0 %v542_v3 }
  0x55   : > { %s393_s5 = scalar_lea.vmem %s1406_s1, %s1176_s11  ;;  %s1214_s26 = sld [smem:[#allocation8 + $0x83]]  ;;  %v873_v32 = vld [vmem:[%s1437_s19] ss:$0 sm:$0xff] }
  0x56   : > { %s1225_s20 = sld [smem:[#allocation8 + $0x203]]  ;;  %450 = vrot.lane.b32.xlu2 %v868_v21, %s1431_s30  ;;  %v874_v27 = vld [vmem:[%s393_s5] ss:$0 sm:$0xff]  ;;  %560 = vmatpush.msra.mxu0 %v541_v4 }
  0x57   : > { %s1232_s22 = sld [smem:[#allocation8 + $0x383]]  ;;  %512 = vrot.lane.b32.xlu1 %v863_v22, %s1431_s30  ;;  %s1439_s4 = scalar_lea.vmem %s1406_s1, %s1189_s2 }
  0x58   : > { %s486_s3 = scalar_lea.vmem %s1406_s1, %s1196_s27  ;;  %481 = vrot.lane.b32.xlu0 %v864_v23, %s1431_s30  ;;  %s1435_s27 = scalar_lea.vmem %s1406_s1, %s1153_s8  ;;  %v876_v35 = vld [vmem:[%s1439_s4] ss:$0 sm:$0xff]  ;;  %561 = vmatpush.msra.mxu0 %v540_v5 }
  0x59   : > { %v870_v29 = vld [vmem:[%s1435_s27] ss:$0 sm:$0xff]  ;;  %s1001_s30 = smov 96   ;;  %s785_s7 = sld [smem:[#allocation8 + $0x200]] }
  0x5a   : > { %s464_s15 = scalar_lea.vmem %s1406_s1, %s1208_s14  ;;  %v877_v30 = vld [vmem:[%s486_s3] ss:$0 sm:$0xff]  ;;  %s1438_s3 = scalar_lea.vmem %s1406_s1, %s1182_s23  ;;  %562 = vmatpush.msra.mxu0 %v539_v7 }
  0x5b   : > { %s340_s17 = scalar_lea.vmem %s1406_s1, %s1214_s26  ;;  %s1000_s26 = smov 64   ;;  %v875_v34 = vld [vmem:[%s1438_s3] ss:$0 sm:$0xff] }
  0x5c   : > { %s433_s0 = scalar_lea.vmem %s1406_s1, %s1225_s20  ;;  %v880_v33 = vld [vmem:[%s340_s17] ss:$0 sm:$0xff]  ;;  %s777_s23 = sld [smem:[#allocation8 + $0x100]]  ;;  %563 = vmatpush.msra.mxu0 %v538_v10 }
  0x5d   : > { %s526_s12 = scalar_lea.vmem %s1406_s1, %s1232_s22  ;;  %v881_v36 = vld [vmem:[%s433_s0] ss:$0 sm:$0xff]  ;;  %s789_s28 = sld [smem:[#allocation8 + $0x280]] }
  0x5e   : > { %302 = vrot.lane.b32.xlu2 %v871_v24, %s1000_s26  ;;  %v879_v38 = vld [vmem:[%s464_s15] ss:$0 sm:$0xff]  ;;  %s282_s15 = sld [smem:[#allocation8]]  ;;  %564 = vmatpush.msra.mxu0 %v537_v11 }
  0x5f   : > { %366 = vrot.lane.b32.xlu1 %v866_v25, %s1000_s26  ;;  %v882_v39 = vld [vmem:[%s526_s12] ss:$0 sm:$0xff]  ;;  %s411_s27 = scalar_lea.vmem %s1406_s1, %s785_s7  ;;  %s781_s22 = sld [smem:[#allocation8 + $0x180]]  ;;  %v1002_v25 = vmov -inf  }
  0x60   : > { %335 = vrot.lane.b32.xlu0 %v867_v26, %s1000_s26  ;;  %v412_v40 = vld [vmem:[%s411_s27] sm:$0x1]  ;;  %s773_s24 = sld [smem:[#allocation8 + $0x80]]  ;;  %565 = vmatpush.msra.mxu0 %v536_v12  ;;  %574 = vst.msk [vmem:[#allocation4] sm:$0xff] %vm573_vm4, %v1002_v25  ;;  %v1003_v26 = vmov 0.0  }
  0x61   : > { %413 = vst.msk [vmem:[#allocation2 + $0x4] sm:$0x1] %vm285_vm0, %v412_v40  ;;  %s797_s19 = sld [smem:[#allocation8 + $0x380]] }
  0x62   : > { %s349_s14 = scalar_lea.vmem %s1406_s1, %s777_s23  ;;  %s793_s18 = sld [smem:[#allocation8 + $0x300]]  ;;  %566 = vmatpush.msra.mxu0 %v535_v14  ;;  %575 = vst.msk [vmem:[#allocation5] sm:$0xff] %vm573_vm4, %v1003_v26 }
  0x63   : > { %v350_v41 = vld [vmem:[%s349_s14] sm:$0x1]  ;;  %s442_s10 = scalar_lea.vmem %s1406_s1, %s789_s28 }
  0x64   : > { %351 = vst.msk [vmem:[#allocation2 + $0x2] sm:$0x1] %vm285_vm0, %v350_v41  ;;  %s283_s5 = scalar_lea.vmem %s1406_s1, %s282_s15  ;;  %v443_v43 = vld [vmem:[%s442_s10] sm:$0x1] }
  0x65   : > { %s380_s29 = scalar_lea.vmem %s1406_s1, %s781_s22  ;;  %v284_v42 = vld [vmem:[%s283_s5] sm:$0x1]  ;;  %444 = vst.msk [vmem:[#allocation2 + $0x5] sm:$0x1] %vm285_vm0, %v443_v43 }
  0x66   : > { %397 = vrot.lane.b32.xlu2 %v874_v27, %s1000_s26  ;;  %286 = vst.msk [vmem:[#allocation2] sm:$0x1] %vm285_vm0, %v284_v42  ;;  %v381_v44 = vld [vmem:[%s380_s29] sm:$0x1]  ;;  %s318_s20 = scalar_lea.vmem %s1406_s1, %s773_s24 }
  0x67   : > { %459 = vrot.lane.b32.xlu1 %v869_v28, %s1000_s26  ;;  %382 = vst.msk [vmem:[#allocation2 + $0x3] sm:$0x1] %vm285_vm0, %v381_v44  ;;  %s504_s9 = scalar_lea.vmem %s1406_s1, %s797_s19  ;;  %v319_v45 = vld [vmem:[%s318_s20] sm:$0x1] }
  0x68   : > { %428 = vrot.lane.b32.xlu0 %v870_v29, %s1000_s26  ;;  %320 = vst.msk [vmem:[#allocation2 + $0x1] sm:$0x1] %vm285_vm0, %v319_v45  ;;  %v505_v46 = vld [vmem:[%s504_s9] sm:$0x1]  ;;  %s473_s21 = scalar_lea.vmem %s1406_s1, %s793_s18 }
  0x69   : > { %506 = vst.msk [vmem:[#allocation2 + $0x7] sm:$0x1] %vm285_vm0, %v505_v46  ;;  %v474_v48 = vld [vmem:[%s473_s21] sm:$0x1] }
  0x6a   : > { %475 = vst.msk [vmem:[#allocation2 + $0x6] sm:$0x1] %vm285_vm0, %v474_v48 }
  0x6e   : > { %490 = vrot.lane.b32.xlu2 %v877_v30, %s1000_s26 }
  0x6f   : > { %312 = vrot.lane.b32.xlu1 %v872_v31, %s1001_s30 }
  0x70   : > { %521 = vrot.lane.b32.xlu0 %v873_v32, %s1000_s26  ;;  %s1440_s26 = scalar_lea.vmem %s1406_s1, %s1202_s25 }
  0x71   : > { %v878_v37 = vld [vmem:[%s1440_s26] ss:$0 sm:$0xff] }
  0x76   : > { %344 = vrot.lane.b32.xlu2 %v880_v33, %s1001_s30 }
  0x77   : > { %406 = vrot.lane.b32.xlu1 %v875_v34, %s1001_s30 }
  0x78   : > { %375 = vrot.lane.b32.xlu0 %v876_v35, %s1001_s30 }
  0x7e   : > { %437 = vrot.lane.b32.xlu2 %v881_v36, %s1001_s30 }
  0x7f   : > { %499 = vrot.lane.b32.xlu1 %v878_v37, %s1001_s30 }
  0x80   : > { %468 = vrot.lane.b32.xlu0 %v879_v38, %s1001_s30 }
  0x86   : > { %530 = vrot.lane.b32.xlu2 %v882_v39, %s1001_s30 }
  0xa8   : > { %v420_v47 = vpop.permute.xlu2 %419 }
  0xa9   : > { %422 = vst.msk [vmem:[#allocation2 + $0x4] sm:$0x1] %vm295_vm1, %v420_v47 }
  0xb0   : > { %v451_v49 = vpop.permute.xlu2 %450 }
  0xb1   : > { %453 = vst.msk [vmem:[#allocation2 + $0x5] sm:$0x1] %vm295_vm1, %v451_v49 }
  0xb8   : > { %v303_v50 = vpop.permute.xlu2 %302 }
  0xb9   : > { %v358_v51 = vpop.permute.xlu1 %357 }
  0xba   : > { %360 = vst.msk [vmem:[#allocation2 + $0x2] sm:$0x1] %vm295_vm1, %v358_v51  ;;  %v293_v52 = vpop.permute.xlu0 %292 }
  0xbb   : > { %296 = vst.msk [vmem:[#allocation2] sm:$0x1] %vm295_vm1, %v293_v52 }
  0xbc   : > { %306 = vst.msk [vmem:[#allocation2] sm:$0x1] %vm305_vm2, %v303_v50 }
  0xc0   : > { %v398_v56 = vpop.permute.xlu2 %397 }
  0xc1   : > { %v389_v58 = vpop.permute.xlu1 %388 }
  0xc2   : > { %391 = vst.msk [vmem:[#allocation2 + $0x3] sm:$0x1] %vm295_vm1, %v389_v58  ;;  %v327_v59 = vpop.permute.xlu0 %326 }
  0xc3   : > { %329 = vst.msk [vmem:[#allocation2 + $0x1] sm:$0x1] %vm295_vm1, %v327_v59 }
  0xc4   : > { %400 = vst.msk [vmem:[#allocation2 + $0x3] sm:$0x1] %vm305_vm2, %v398_v56 }
  0xc8   : > { %v491_v63 = vpop.permute.xlu2 %490 }
  0xc9   : > { %v513_v1 = vpop.permute.xlu1 %512 }
  0xca   : > { %515 = vst.msk [vmem:[#allocation2 + $0x7] sm:$0x1] %vm295_vm1, %v513_v1  ;;  %v482_v2 = vpop.permute.xlu0 %481 }
  0xcb   : > { %484 = vst.msk [vmem:[#allocation2 + $0x6] sm:$0x1] %vm295_vm1, %v482_v2 }
  0xcc   : > { %493 = vst.msk [vmem:[#allocation2 + $0x6] sm:$0x1] %vm305_vm2, %v491_v63 }
  0xd0   : > { %v345_v6 = vpop.permute.xlu2 %344 }
  0xd1   : > { %v367_v8 = vpop.permute.xlu1 %366 }
  0xd2   : > { %369 = vst.msk [vmem:[#allocation2 + $0x2] sm:$0x1] %vm305_vm2, %v367_v8  ;;  %v336_v9 = vpop.permute.xlu0 %335 }
  0xd3   : > { %338 = vst.msk [vmem:[#allocation2 + $0x1] sm:$0x1] %vm305_vm2, %v336_v9 }
  0xd4   : > { %347 = vst.msk [vmem:[#allocation2 + $0x1] sm:$0x1] %vm315_vm3, %v345_v6 }
  0xd8   : > { %v438_v13 = vpop.permute.xlu2 %437 }
  0xd9   : > { %v460_v15 = vpop.permute.xlu1 %459 }
  0xda   : > { %462 = vst.msk [vmem:[#allocation2 + $0x5] sm:$0x1] %vm305_vm2, %v460_v15  ;;  %v429_v16 = vpop.permute.xlu0 %428 }
  0xdb   : > { %431 = vst.msk [vmem:[#allocation2 + $0x4] sm:$0x1] %vm305_vm2, %v429_v16 }
  0xdc   : > { %440 = vst.msk [vmem:[#allocation2 + $0x4] sm:$0x1] %vm315_vm3, %v438_v13 }
  0xe0   : > { %v531_v18 = vpop.permute.xlu2 %530 }
  0xe1   : > { %v313_v17 = vpop.permute.xlu1 %312 }
  0xe2   : > { %316 = vst.msk [vmem:[#allocation2] sm:$0x1] %vm315_vm3, %v313_v17  ;;  %v522_v19 = vpop.permute.xlu0 %521 }
  0xe3   : > { %524 = vst.msk [vmem:[#allocation2 + $0x7] sm:$0x1] %vm305_vm2, %v522_v19 }
  0xe4   : > { %533 = vst.msk [vmem:[#allocation2 + $0x7] sm:$0x1] %vm315_vm3, %v531_v18 }
  0xe9   : > { %v407_v20 = vpop.permute.xlu1 %406 }
  0xea   : > { %409 = vst.msk [vmem:[#allocation2 + $0x3] sm:$0x1] %vm315_vm3, %v407_v20  ;;  %v376_v21 = vpop.permute.xlu0 %375 }
  0xeb   : > { %378 = vst.msk [vmem:[#allocation2 + $0x2] sm:$0x1] %vm315_vm3, %v376_v21 }
  0xf1   : > { %v500_v22 = vpop.permute.xlu1 %499 }
  0xf2   : > { %502 = vst.msk [vmem:[#allocation2 + $0x6] sm:$0x1] %vm315_vm3, %v500_v22  ;;  %v469_v23 = vpop.permute.xlu0 %468 }
  0xf3   : > { %471 = vst.msk [vmem:[#allocation2 + $0x5] sm:$0x1] %vm315_vm3, %v469_v23 }
  0xfa   : > { %v534_v24 = vld [vmem:[#allocation2] sm:$0xff] }
  0xfb   : > { %567 = vmatmul.f32.vlgmr.msra.gmra.mxu0 %v534_v24 }
 0x178   : > { %v568_v27 = vpop.f32.mrf.mxu0 }
 0x179   : > { %v571_v28 = vmax.f32 %v568_v27, 0.0 }
 0x17b   : > { %572 = vst [vmem:[#allocation3] sm:$0xff] %v571_v28 }
 0x17c PF: > { %s1441_s0 = sld [smem:[#allocation21_spill]]  ;;  %v1004_v47 = vmov 0   ;;  %v616_v48 = vld [vmem:[#allocation4] sm:$0xff]  ;;  %vm636_vm5 = vcmask 7168   ;;  %v620_v58 = vld [vmem:[#allocation5] sm:$0xff] }
 0x17d   : > { %s1442_s6 = sld [smem:[#allocation18_spill]]  ;;  %883 = vset.pattern.permute.xlu0 %v1004_v47 }
 0x182   : > { %v592_v29 = vld [vmem:[%s1441_s0 + $0x78] sm:$0xff]  ;;  %v591_v30 = vld [vmem:[%s1441_s0 + $0x70] sm:$0xff]  ;;  %v590_v31 = vld [vmem:[%s1441_s0 + $0x68] sm:$0xff] }
 0x183   : > { %593 = vmatpush.msra.mxu0 %v592_v29  ;;  %v589_v32 = vld [vmem:[%s1441_s0 + $0x60] sm:$0xff]  ;;  %v588_v33 = vld [vmem:[%s1441_s0 + $0x58] sm:$0xff]  ;;  %v587_v34 = vld [vmem:[%s1441_s0 + $0x50] sm:$0xff]  ;;  %s801_s27 = sshll.u32 %s1442_s6, 3  ;;  %p802_p12 = scmp.ne.s32.totalorder %s1442_s6, 1 }
 0x184   : > { %v586_v35 = vld [vmem:[%s1441_s0 + $0x48] sm:$0xff]  ;;  %v585_v36 = vld [vmem:[%s1441_s0 + $0x40] sm:$0xff]  ;;  %v584_v37 = vld [vmem:[%s1441_s0 + $0x38] sm:$0xff]  ;;  %s614_s25 = scalar_lea.vmem [#allocation6], %s801_s27 }
 0x185   : > { %594 = vmatpush.msra.mxu0 %v591_v30  ;;  %v583_v38 = vld [vmem:[%s1441_s0 + $0x30] sm:$0xff]  ;;  %v582_v39 = vld [vmem:[%s1441_s0 + $0x28] sm:$0xff]  ;;  %v581_v40 = vld [vmem:[%s1441_s0 + $0x20] sm:$0xff] }
 0x186   : > { %v580_v41 = vld [vmem:[%s1441_s0 + $0x18] sm:$0xff]  ;;  %v579_v42 = vld [vmem:[%s1441_s0 + $0x10] sm:$0xff]  ;;  %v578_v43 = vld [vmem:[%s1441_s0 + $0x8] sm:$0xff] }
 0x187   : > { %595 = vmatpush.msra.mxu0 %v590_v31  ;;  %v577_v44 = vld [vmem:[%s1441_s0] sm:$0xff]  ;;  %v576_v45 = vld [vmem:[#allocation3] sm:$0xff] }
 0x189   : > { %596 = vmatpush.msra.mxu0 %v589_v32 }
 0x18b   : > { %597 = vmatpush.msra.mxu0 %v588_v33 }
 0x18d   : > { %598 = vmatpush.msra.mxu0 %v587_v34 }
 0x18f   : > { %599 = vmatpush.msra.mxu0 %v586_v35 }
 0x191   : > { %600 = vmatpush.msra.mxu0 %v585_v36 }
 0x193   : > { %601 = vmatpush.msra.mxu0 %v584_v37 }
 0x195   : > { %602 = vmatpush.msra.mxu0 %v583_v38 }
 0x197   : > { %603 = vmatpush.msra.mxu0 %v582_v39 }
 0x199   : > { %604 = vmatpush.msra.mxu0 %v581_v40 }
 0x19b   : > { %605 = vmatpush.msra.mxu0 %v580_v41 }
 0x19d   : > { %606 = vmatpush.msra.mxu0 %v579_v42 }
 0x19f   : > { %607 = vmatpush.msra.mxu0 %v578_v43 }
 0x1a1   : > { %608 = vmatpush.msra.mxu0 %v577_v44 }
 0x1a2   : > { %609 = vmatmul.f32.vlgmr.msra.gmra.mxu0 %v576_v45 }
 0x21f   : > { %v610_v46 = vpop.f32.mrf.mxu0 }
 0x220   : > { %615 = vst [vmem:[%s614_s25] sm:$0xff] %v610_v46  ;;  %617 = vmax.xlane.f32.xlu0 %v610_v46 }
 0x293   : > { %v618_v49 = vpop.xlane.xlu0 %617 }
 0x294   : > { %v619_v50 = vmax.f32 %v616_v48, %v618_v49 }
 0x296   : > { %v621_v51 = vsub.f32 %v616_v48, %v619_v50  ;;  %638 = vst.msk [vmem:[#allocation4] sm:$0xff] %vm636_vm5, %v619_v50  ;;  %627 = vperm.xlu0 %883, %v619_v50  }
 0x298   : > { %v622_v56 = vmul.f32 1.442695, %v621_v51 }
 0x308   : > { %v628_v52 = vpop.permute.xlu0 %627 }
 0x309   : > { %v630_v53 = vsub.f32 %v610_v46, %v628_v52 }
 0x30b   : > { %v631_v54 = vmul.f32 1.442695, %v630_v53 }
 0x30d   : > { %884 = vpow2.f32 %v631_v54 }
 0x30e   : > { %886 = vpow2.f32 %v622_v56 }
 0x313   : > { %v885_v55 = vpop.eup %884 }
 0x314   : > { %633 = vadd.xlane.f32.xlu1 %v885_v55  ;;  %v887_v57 = vpop.eup %886 }
 0x315   : > { %v624_v59 = vmul.f32 %v887_v57, %v620_v58 }
 0x386   : > { %642 = sbr.rel (%p802_p12) target bundleno = 1044 (0x414), region = 82 }
 0x387   : > { %v634_v60 = vpop.xlane.xlu1 %633 }
 0x388   : > { %v635_v61 = vadd.f32 %v634_v60, %v624_v59 }
 0x38a   : > { %637 = vst.msk [vmem:[#allocation5] sm:$0xff] %vm636_vm5, %v635_v61 }
 0x38b   : > { %v1005_v63 = vmov 0   ;;  %v643_v1 = vld [vmem:[#allocation4] sm:$0xff]  ;;  %v648_v4 = vld [vmem:[#allocation6] sm:$0xff]  ;;  %v657_v5 = vld [vmem:[#allocation6 + $0x8] sm:$0xff] }
 0x38c   : > { %888 = vset.pattern.permute.xlu0 %v1005_v63 }
 0x391   : > { %v644_v62 = vld [vmem:[#allocation5] sm:$0xff] }
 0x392   : > { %889 = vlog2.f32 %v644_v62 }
 0x398   : > { %v890_v0 = vpop.eup %889 }
 0x399   : > { %v646_v2 = vmul.f32 0.6931472, %v890_v0 }
 0x39b   : > { %v647_v3 = vadd.f32 %v646_v2, %v643_v1 }
 0x39d   : > { %651 = vperm.xlu0 %888, %v647_v3  }
 0x40f   : > { %v652_v6 = vpop.permute.xlu0 %651 }
 0x410   : > { %v654_v7 = vsub.f32 %v648_v4, %v652_v6  ;;  %v658_v8 = vsub.f32 %v657_v5, %v652_v6 }
 0x412   : > { %655 = vst [vmem:[#allocation13] sm:$0xff] %v654_v7 }
 0x413   : > { %659 = vst [vmem:[#allocation13 + $0x8] sm:$0xff] %v658_v8 }
 0x414 PF: > { %s1443_s13 = sld [smem:[#allocation18_spill]]  ;;  %s1006_s14 = smov [#allocation13]  }
 0x415   : > { %s666_s15 = sshll.u32 %s1006_s14, 4  ;;  %s1444_s12 = sld [smem:[#allocation24_spill]]  ;;  %s667_s15 = int_to_ptr.vmem [resolvable:$true] %s666_s15 }
 0x41a   : > { %p821_p13 = scmp.eq.s32.totalorder %s1443_s13, 1 }
 0x41b   : > { %s668_s16 = sshll.u32 %s1444_s12, 4  ;;  %s669_s16 = int_to_ptr.hbm [resolvable:$true] %s668_s16 }
 0x41c   : > { %812 = dma.vmem_to_hbm [thread:$0]  (%p821_p13), %s667_s15, 256, %s669_s16, [#allocation11]  }
 0x41d   : > { %980 = dma.done.wait (%p821_p13), [#allocation11], 256  }
 0x41e   : > { %982 = vsyncadd (%p821_p13), [#allocation11], 4294967040 }
 0x41f PF: > { %s1445_s21 = sld [smem:[#allocation19_spill]] }
 0x420   : > { %s1446_s19 = sld [smem:[#allocation17_spill]] }
 0x421   : > { %s1447_s20 = sld [smem:[#allocation20_spill]] }
 0x425   : > { %p21_p0 = scmp.ge.s32.totalorder %s1445_s21, 4  }
 0x427   :  { %23 = sbr.rel (!%p21_p0) target bundleno = 11 (0xb), region = 149 }
 0x42c   :  { %682 = vsyncpa [#allocation10], 1 }
 0x42d   :  { %684 = vsyncpa [#allocation10 + $0x1], 1 }
 0x42e   :  { %685 = vsyncpa [#allocation11], 1 }
 0x42f   :  { %687 = vsyncpa [#allocation11 + $0x1], 1 }

</bundles_post_ra>
